<compile_context>
chip_gen: v5e
topology: v5e:2x2
jax: 0.10.0
libtpu: 0.0.40
codegen_flags: <defaults>
</compile_context>

<pallas_src>
import functools
import math

import jax
import jax.numpy as jnp
from jax.experimental import pallas as pl
from jax.experimental.pallas import tpu as pltpu


def _cdiv(a, b):
    return -(-a // b)


def _label_smoothing_kernel(x_ref, tgt_ref, loss_ref, ntok_ref,
                            loss_acc, ntok_acc, *,
                            padding_idx, smooth_val, confidence, c_const, n_rows):
    c = pl.program_id(0)                  # parallel chunk (row shard, v7x: one per TC)
    i = pl.program_id(1)                  # sequential tile within the chunk
    tiles_per_chunk = pl.num_programs(1)

    @pl.when(i == 0)
    def _():
        loss_acc[...] = jnp.zeros_like(loss_acc)
        ntok_acc[...] = jnp.zeros_like(ntok_acc)

    x = x_ref[...].astype(jnp.float32)    # (tn, V) log-probs
    tgt = tgt_ref[...]                    # (tn, 1) int32 labels

    tn, V = x.shape
    col = jax.lax.broadcasted_iota(jnp.int32, (tn, V), 1)

    # The smoothed "true" distribution as a weight tile (no log needed):
    #   smooth_val everywhere, confidence at the target column, 0 at the padding column.
    w = jnp.where(col == tgt, jnp.float32(confidence), jnp.float32(smooth_val))
    w = jnp.where(col == padding_idx, jnp.float32(0.0), w)

    weighted = jnp.sum(w * x, axis=-1, keepdims=True)        # (tn, 1) = sum_v td*x
    per_row = jnp.float32(c_const) - weighted                 # KL per valid row

    # Row validity: inside the un-padded N and not a padding-target row.
    row0 = (c * tiles_per_chunk + i) * tn
    row_id = row0 + jax.lax.broadcasted_iota(jnp.int32, (tn, 1), 0)
    in_range = row_id < n_rows
    valid = jnp.logical_and(in_range, tgt != padding_idx)

    per_row = jnp.where(valid, per_row, jnp.float32(0.0))
    # PyTorch module hard-codes `target != 0` for the normalizer (not padding_idx).
    ntok_rows = jnp.where(jnp.logical_and(in_range, tgt != 0),
                          jnp.float32(1.0), jnp.float32(0.0))

    loss_acc[...] = loss_acc[...] + jnp.sum(per_row)
    ntok_acc[...] = ntok_acc[...] + jnp.sum(ntok_rows)

    @pl.when(i == tiles_per_chunk - 1)
    def _():
        loss_ref[...] = loss_acc[...]
        ntok_ref[...] = ntok_acc[...]


def label_smoothing_loss(x, target, *, padding_idx=0, smoothing=0.1,
                         tile_n=None, n_chunks=2):
    """x: (B, S, V) log-probs (f32 or bf16); target: (B, S) int. Returns scalar loss / ntokens."""
    V = x.shape[-1]
    assert V > 2, "label smoothing needs vocab size > 2"
    x2 = x.reshape(-1, V)                             # keep input dtype; kernel upcasts
    tgt2 = target.reshape(-1, 1).astype(jnp.int32)
    N = x2.shape[0]

    # Row tile: ~2 MiB x-blocks (double-buffered ~4 MiB, safe on v5e/v6e/v7x scoped VMEM),
    # multiple of 8, but no larger than the (8-rounded) problem actually needs.
    if tile_n is None:
        bytes_per_row = V * x2.dtype.itemsize
        tile_n = max(8, min(512, ((2 << 20) // max(1, bytes_per_row)) // 8 * 8))
    tile_n = max(8, min(int(tile_n), _cdiv(N, 8) * 8))

    tiles = _cdiv(N, tile_n)
    n_chunks = max(1, min(int(n_chunks), tiles))      # leading 'parallel' axis
    tiles_per_chunk = _cdiv(tiles, n_chunks)
    n_padded = n_chunks * tiles_per_chunk * tile_n
    if n_padded != N:
        x2 = jnp.pad(x2, ((0, n_padded - N), (0, 0)))
        tgt2 = jnp.pad(tgt2, ((0, n_padded - N), (0, 0)))

    confidence = 1.0 - smoothing
    smooth_val = smoothing / (V - 2)
    c_const = 0.0
    if smooth_val > 0.0:
        c_const += (V - 2) * smooth_val * math.log(smooth_val)
    if confidence > 0.0:
        c_const += confidence * math.log(confidence)

    kernel = functools.partial(
        _label_smoothing_kernel,
        padding_idx=int(padding_idx),
        smooth_val=float(smooth_val),
        confidence=float(confidence),
        c_const=float(c_const),
        n_rows=int(N),
    )

    loss_part, ntok_part = pl.pallas_call(
        kernel,
        out_shape=(
            jax.ShapeDtypeStruct((n_chunks, 1, 128), jnp.float32),
            jax.ShapeDtypeStruct((n_chunks, 1, 128), jnp.float32),
        ),
        grid_spec=pltpu.PrefetchScalarGridSpec(
            num_scalar_prefetch=0,
            grid=(n_chunks, tiles_per_chunk),
            in_specs=[
                pl.BlockSpec((tile_n, V), lambda c, i: (c * tiles_per_chunk + i, 0)),
                pl.BlockSpec((tile_n, 1), lambda c, i: (c * tiles_per_chunk + i, 0)),
            ],
            out_specs=[
                pl.BlockSpec((1, 1, 128), lambda c, i: (c, 0, 0)),
                pl.BlockSpec((1, 1, 128), lambda c, i: (c, 0, 0)),
            ],
            scratch_shapes=[
                pltpu.VMEM((1, 1, 128), jnp.float32),
                pltpu.VMEM((1, 1, 128), jnp.float32),
            ],
        ),
        compiler_params=pltpu.CompilerParams(
            dimension_semantics=("parallel", "arbitrary"),
        ),
    )(x2, tgt2)

    loss_sum = jnp.sum(loss_part[:, 0, 0])
    ntok = jnp.sum(ntok_part[:, 0, 0])
    return loss_sum / ntok


def _reference_loss(x, target, padding_idx, smoothing):
    """Pure-JAX mirror of the PyTorch LabelSmoothing forward."""
    V = x.shape[-1]
    x2 = x.reshape(-1, V).astype(jnp.float32)
    t = target.reshape(-1)
    conf = 1.0 - smoothing
    sv = smoothing / (V - 2)
    td = jnp.full_like(x2, sv)
    td = td.at[jnp.arange(t.shape[0]), t].set(conf)
    td = td.at[:, padding_idx].set(0.0)
    td = jnp.where((t == padding_idx)[:, None], 0.0, td)
    ntok = jnp.sum((target != 0).astype(jnp.float32))
    safe = jnp.where(td > 0, td, 1.0)
    kl = jnp.sum(jnp.where(td > 0, td * (jnp.log(safe) - x2), 0.0))
    return kl / ntok


if __name__ == "__main__":
    key = jax.random.PRNGKey(0)
    B, S, V = 2, 8, 128
    padding_idx = 0
    smoothing = 0.1

    k1, k2 = jax.random.split(key)
    logits = jax.random.normal(k1, (B, S, V), dtype=jnp.float32)
    x = jax.nn.log_softmax(logits, axis=-1)          # module expects log-probabilities
    target = jax.random.randint(k2, (B, S), 0, V, dtype=jnp.int32)
    # make a couple of tokens padding to exercise the masking path
    target = target.at[0, 0].set(padding_idx)
    target = target.at[1, 3].set(padding_idx)

    loss = label_smoothing_loss(x, target, padding_idx=padding_idx, smoothing=smoothing)
    loss = jax.block_until_ready(loss)

    ref = jax.block_until_ready(_reference_loss(x, target, padding_idx, smoothing))
    assert jnp.allclose(loss, ref, rtol=5e-4, atol=5e-4), (float(loss), float(ref))

    print("KERNEL_OK")
</pallas_src>

<mosaic_0001>
module attributes {stable_mosaic.version = 11 : i64} {
  func.func @_label_smoothing_kernel(%arg0: i32, %arg1: i32, %arg2: memref<16x128xf32, #tpu.memory_space<vmem>>, %arg3: memref<16x1xi32, #tpu.memory_space<vmem>>, %arg4: memref<1x1x128xf32, #tpu.memory_space<vmem>>, %arg5: memref<1x1x128xf32, #tpu.memory_space<vmem>>, %arg6: memref<1x1x128xf32, #tpu.memory_space<vmem>>, %arg7: memref<1x1x128xf32, #tpu.memory_space<vmem>>) attributes {dimension_semantics = [#tpu.dimension_semantics<parallel>, #tpu.dimension_semantics<arbitrary>], iteration_bounds = array<i64: 1, 1>, scalar_prefetch = 0 : i64, scratch_operands = 2 : i64, tpu.core_type = #tpu.core_type<tc>, window_params = [{transform_indices = @transform_0, window_bounds = array<i64: 16, 128>}, {transform_indices = @transform_1, window_bounds = array<i64: 16, 1>}, {transform_indices = @transform_2, window_bounds = array<i64: 1, 1, 128>}, {transform_indices = @transform_3, window_bounds = array<i64: 1, 1, 128>}]} {
    %c0_i32 = arith.constant 0 : i32
    %0 = arith.cmpi eq, %arg1, %c0_i32 : i32
    %1 = arith.extui %0 : i1 to i32
    %c0_i32_0 = arith.constant 0 : i32
    %2 = arith.cmpi ne, %1, %c0_i32_0 : i32
    scf.if %2 {
      %cst_31 = arith.constant 0.000000e+00 : f32
      %58 = vector.broadcast %cst_31 : f32 to vector<1x1x128xf32>
      %c0_32 = arith.constant 0 : index
      %c0_33 = arith.constant 0 : index
      %c0_34 = arith.constant 0 : index
      %59 = vector.load %arg6[%c0_32, %c0_33, %c0_34] : memref<1x1x128xf32, #tpu.memory_space<vmem>>, vector<1x1x128xf32>
      tpu.vector_store %arg6[%c0_32, %c0_33, %c0_34], %58 {strides = array<i32>} : memref<1x1x128xf32, #tpu.memory_space<vmem>>, vector<1x1x128xf32>,
      %cst_35 = arith.constant 0.000000e+00 : f32
      %60 = vector.broadcast %cst_35 : f32 to vector<1x1x128xf32>
      %c0_36 = arith.constant 0 : index
      %c0_37 = arith.constant 0 : index
      %c0_38 = arith.constant 0 : index
      %61 = vector.load %arg7[%c0_36, %c0_37, %c0_38] : memref<1x1x128xf32, #tpu.memory_space<vmem>>, vector<1x1x128xf32>
      tpu.vector_store %arg7[%c0_36, %c0_37, %c0_38], %60 {strides = array<i32>} : memref<1x1x128xf32, #tpu.memory_space<vmem>>, vector<1x1x128xf32>,
    } else {
    }
    %c0 = arith.constant 0 : index
    %c0_1 = arith.constant 0 : index
    %3 = vector.load %arg2[%c0, %c0_1] : memref<16x128xf32, #tpu.memory_space<vmem>>, vector<16x128xf32>
    %c0_2 = arith.constant 0 : index
    %c0_3 = arith.constant 0 : index
    %4 = vector.load %arg3[%c0_2, %c0_3] : memref<16x1xi32, #tpu.memory_space<vmem>>, vector<16x1xi32>
    %5 = tpu.iota {dimensions = array<i32: 1>} : vector<16x128xi32>
    %6 = vector.broadcast %4 : vector<16x1xi32> to vector<16x128xi32>
    %7 = arith.cmpi eq, %5, %6 : vector<16x128xi32>
    %cst = arith.constant 0.899999976 : f32
    %cst_4 = arith.constant 7.93650805E-4 : f32
    %8 = vector.broadcast %cst : f32 to vector<16x128xf32>
    %9 = vector.broadcast %cst_4 : f32 to vector<16x128xf32>
    %10 = arith.select %7, %8, %9 : vector<16x128xi1>, vector<16x128xf32>
    %c0_i32_5 = arith.constant 0 : i32
    %11 = vector.broadcast %c0_i32_5 : i32 to vector<16x128xi32>
    %12 = arith.cmpi eq, %5, %11 : vector<16x128xi32>
    %cst_6 = arith.constant 0.000000e+00 : f32
    %13 = vector.broadcast %cst_6 : f32 to vector<16x128xf32>
    %14 = arith.select %12, %13, %10 : vector<16x128xi1>, vector<16x128xf32>
    %15 = arith.mulf %14, %3 : vector<16x128xf32>
    %cst_7 = arith.constant dense<0.000000e+00> : vector<16xf32>
    %16 = vector.multi_reduction <add>, %15, %cst_7 [1] : vector<16x128xf32> to vector<16xf32>
    %17 = vector.shape_cast %16 : vector<16xf32> to vector<16x1xf32>
    %cst_8 = arith.constant -0.808711171 : f32
    %18 = vector.broadcast %cst_8 : f32 to vector<16x1xf32>
    %19 = arith.subf %18, %17 : vector<16x1xf32>
    %c1_i32 = arith.constant 1 : i32
    %20 = arith.muli %arg0, %c1_i32 : i32
    %21 = arith.addi %20, %arg1 : i32
    %c16_i32 = arith.constant 16 : i32
    %22 = arith.muli %21, %c16_i32 : i32
    %23 = tpu.iota {dimensions = array<i32: 0>} : vector<16x1xi32>
    %24 = vector.broadcast %22 : i32 to vector<16x1xi32>
    %25 = arith.addi %24, %23 : vector<16x1xi32>
    %c16_i32_9 = arith.constant 16 : i32
    %26 = vector.broadcast %c16_i32_9 : i32 to vector<16x1xi32>
    %27 = arith.cmpi slt, %25, %26 : vector<16x1xi32>
    %c0_i32_10 = arith.constant 0 : i32
    %28 = vector.broadcast %c0_i32_10 : i32 to vector<16x1xi32>
    %29 = arith.cmpi ne, %4, %28 : vector<16x1xi32>
    %30 = arith.andi %27, %29 : vector<16x1xi1>
    %cst_11 = arith.constant 0.000000e+00 : f32
    %31 = vector.broadcast %cst_11 : f32 to vector<16x1xf32>
    %32 = arith.select %30, %19, %31 : vector<16x1xi1>, vector<16x1xf32>
    %c0_i32_12 = arith.constant 0 : i32
    %33 = vector.broadcast %c0_i32_12 : i32 to vector<16x1xi32>
    %34 = arith.cmpi ne, %4, %33 : vector<16x1xi32>
    %35 = arith.andi %27, %34 : vector<16x1xi1>
    %cst_13 = arith.constant 1.000000e+00 : f32
    %cst_14 = arith.constant 0.000000e+00 : f32
    %36 = vector.broadcast %cst_13 : f32 to vector<16x1xf32>
    %37 = vector.broadcast %cst_14 : f32 to vector<16x1xf32>
    %38 = arith.select %35, %36, %37 : vector<16x1xi1>, vector<16x1xf32>
    %c0_15 = arith.constant 0 : index
    %c0_16 = arith.constant 0 : index
    %c0_17 = arith.constant 0 : index
    %39 = vector.load %arg6[%c0_15, %c0_16, %c0_17] : memref<1x1x128xf32, #tpu.memory_space<vmem>>, vector<1x1x128xf32>
    %40 = vector.shape_cast %32 : vector<16x1xf32> to vector<1x16x1xf32>
    %cst_18 = arith.constant dense<0.000000e+00> : vector<1xf32>
    %41 = vector.multi_reduction <add>, %40, %cst_18 [1, 2] : vector<1x16x1xf32> to vector<1xf32>
    %42 = vector.shape_cast %41 : vector<1xf32> to vector<1x1x1xf32>
    %43 = vector.extract %42[0, 0, 0] : f32 from vector<1x1x1xf32>
    %44 = vector.broadcast %43 : f32 to vector<1x1x128xf32>
    %45 = arith.addf %39, %44 : vector<1x1x128xf32>
    %c0_19 = arith.constant 0 : index
    %c0_20 = arith.constant 0 : index
    %c0_21 = arith.constant 0 : index
    %46 = vector.load %arg6[%c0_19, %c0_20, %c0_21] : memref<1x1x128xf32, #tpu.memory_space<vmem>>, vector<1x1x128xf32>
    tpu.vector_store %arg6[%c0_19, %c0_20, %c0_21], %45 {strides = array<i32>} : memref<1x1x128xf32, #tpu.memory_space<vmem>>, vector<1x1x128xf32>,
    %c0_22 = arith.constant 0 : index
    %c0_23 = arith.constant 0 : index
    %c0_24 = arith.constant 0 : index
    %47 = vector.load %arg7[%c0_22, %c0_23, %c0_24] : memref<1x1x128xf32, #tpu.memory_space<vmem>>, vector<1x1x128xf32>
    %48 = vector.shape_cast %38 : vector<16x1xf32> to vector<1x16x1xf32>
    %cst_25 = arith.constant dense<0.000000e+00> : vector<1xf32>
    %49 = vector.multi_reduction <add>, %48, %cst_25 [1, 2] : vector<1x16x1xf32> to vector<1xf32>
    %50 = vector.shape_cast %49 : vector<1xf32> to vector<1x1x1xf32>
    %51 = vector.extract %50[0, 0, 0] : f32 from vector<1x1x1xf32>
    %52 = vector.broadcast %51 : f32 to vector<1x1x128xf32>
    %53 = arith.addf %47, %52 : vector<1x1x128xf32>
    %c0_26 = arith.constant 0 : index
    %c0_27 = arith.constant 0 : index
    %c0_28 = arith.constant 0 : index
    %54 = vector.load %arg7[%c0_26, %c0_27, %c0_28] : memref<1x1x128xf32, #tpu.memory_space<vmem>>, vector<1x1x128xf32>
    tpu.vector_store %arg7[%c0_26, %c0_27, %c0_28], %53 {strides = array<i32>} : memref<1x1x128xf32, #tpu.memory_space<vmem>>, vector<1x1x128xf32>,
    %c0_i32_29 = arith.constant 0 : i32
    %55 = arith.cmpi eq, %arg1, %c0_i32_29 : i32
    %56 = arith.extui %55 : i1 to i32
    %c0_i32_30 = arith.constant 0 : i32
    %57 = arith.cmpi ne, %56, %c0_i32_30 : i32
    scf.if %57 {
      %c0_31 = arith.constant 0 : index
      %c0_32 = arith.constant 0 : index
      %c0_33 = arith.constant 0 : index
      %58 = vector.load %arg6[%c0_31, %c0_32, %c0_33] : memref<1x1x128xf32, #tpu.memory_space<vmem>>, vector<1x1x128xf32>
      %c0_34 = arith.constant 0 : index
      %c0_35 = arith.constant 0 : index
      %c0_36 = arith.constant 0 : index
      %59 = vector.load %arg4[%c0_34, %c0_35, %c0_36] : memref<1x1x128xf32, #tpu.memory_space<vmem>>, vector<1x1x128xf32>
      tpu.vector_store %arg4[%c0_34, %c0_35, %c0_36], %58 {strides = array<i32>} : memref<1x1x128xf32, #tpu.memory_space<vmem>>, vector<1x1x128xf32>,
      %c0_37 = arith.constant 0 : index
      %c0_38 = arith.constant 0 : index
      %c0_39 = arith.constant 0 : index
      %60 = vector.load %arg7[%c0_37, %c0_38, %c0_39] : memref<1x1x128xf32, #tpu.memory_space<vmem>>, vector<1x1x128xf32>
      %c0_40 = arith.constant 0 : index
      %c0_41 = arith.constant 0 : index
      %c0_42 = arith.constant 0 : index
      %61 = vector.load %arg5[%c0_40, %c0_41, %c0_42] : memref<1x1x128xf32, #tpu.memory_space<vmem>>, vector<1x1x128xf32>
      tpu.vector_store %arg5[%c0_40, %c0_41, %c0_42], %60 {strides = array<i32>} : memref<1x1x128xf32, #tpu.memory_space<vmem>>, vector<1x1x128xf32>,
    } else {
    }
    return
  }
  func.func @transform_0(%arg0: i32, %arg1: i32) -> (i32, i32) {
    %c1_i32 = arith.constant 1 : i32
    %0 = arith.muli %arg0, %c1_i32 : i32
    %1 = arith.addi %0, %arg1 : i32
    %c0_i32 = arith.constant 0 : i32
    %c0_i32_0 = arith.constant 0 : i32
    return %1, %c0_i32 : i32, i32
  }
  func.func @transform_1(%arg0: i32, %arg1: i32) -> (i32, i32) {
    %c1_i32 = arith.constant 1 : i32
    %0 = arith.muli %arg0, %c1_i32 : i32
    %1 = arith.addi %0, %arg1 : i32
    %c0_i32 = arith.constant 0 : i32
    %c0_i32_0 = arith.constant 0 : i32
    return %1, %c0_i32 : i32, i32
  }
  func.func @transform_2(%arg0: i32, %arg1: i32) -> (i32, i32, i32) {
    %c0_i32 = arith.constant 0 : i32
    %c0_i32_0 = arith.constant 0 : i32
    %c0_i32_1 = arith.constant 0 : i32
    return %arg0, %c0_i32, %c0_i32_0 : i32, i32, i32
  }
  func.func @transform_3(%arg0: i32, %arg1: i32) -> (i32, i32, i32) {
    %c0_i32 = arith.constant 0 : i32
    %c0_i32_0 = arith.constant 0 : i32
    %c0_i32_1 = arith.constant 0 : i32
    return %arg0, %c0_i32, %c0_i32_0 : i32, i32, i32
  }
}

</mosaic_0001>

<bundles_post_ra>
// kernel: tpu_custom_call.1
= control target key start
LH: loop header
LB: loop body
LE: loop exit
PB: predicated region body
PF: predicated region fallthrough
CT: control target
= control target key end

     0   :  { %9 = vsyncpa [#allocation5], 0  ;;  %v256_v1 = vmov 0   ;;  %v257_v2 = vmov 0.0   ;;  %s299_s0 = inlined_call_operand.vmem [shape: f32[16,128], index: 0, kind: input, shape index: {}]   ;;  %s300_s1 = inlined_call_operand.vmem [shape: s32[16,1], index: 1, kind: input, shape index: {}]   ;;  %s301_s2 = inlined_call_operand.hbm [shape: f32[1,1,128], index: 2, kind: output, shape index: {0}]   ;;  %s302_s3 = inlined_call_operand.hbm [shape: f32[1,1,128], index: 3, kind: output, shape index: {1}]  }
   0x1   :  { %v67_v0 = vld [vmem:[%s300_s1] sm:$0xff]  ;;  %203 = vset.pattern.permute.xlu0 %v256_v1  ;;  %63 = vst [vmem:[#allocation2] sm:$0x1] %v257_v2 }
   0x2   :  { %10 = vsyncpa [#allocation7], 0  ;;  %72 = vperm.xlu0 %203, %v67_v0   ;;  %64 = vst [vmem:[#allocation3] sm:$0x1] %v257_v2  ;;  %v68_v3 = vld [vmem:[%s300_s1 + $0x8] sm:$0xff]  ;;  %v69_v4 = vlaneseq  ;;  %v65_v7 = vld [vmem:[%s299_s0] sm:$0xff] }
   0x3   :  { %v258_v8 = vmov 0.0007936508   ;;  %v66_v13 = vld [vmem:[%s299_s0 + $0x8] sm:$0xff]  ;;  %vm102_vm3 = vcmp.ne.s32.totalorder %v67_v0, 0  ;;  %vm103_vm4 = vcmp.ne.s32.totalorder %v68_v3, 0  ;;  %vm111_vm5 = vcmask 7168  }
   0x4   :  { %v70_v5 = vand.u32 127, %v69_v4  ;;  %v108_v25 = vsel %vm102_vm3, 1.0, %v257_v2  ;;  %v109_v27 = vsel %vm103_vm4, 1.0, %v257_v2  ;;  %s157_s21 = sshll.u32 %s301_s2, 4  ;;  %s259_s23 = smov [#allocation4]   ;;  %s158_s21 = int_to_ptr.hbm [resolvable:$true] %s157_s21 }
   0x5   :  { %v128_v28 = vsel %vm111_vm5, %v108_v25, 0.0  ;;  %v129_v29 = vsel %vm111_vm5, %v109_v27, 0.0  ;;  %s155_s24 = sshll.u32 %s259_s23, 4  ;;  %s260_s25 = smov [#allocation6]   ;;  %s156_s24 = int_to_ptr.vmem [resolvable:$true] %s155_s24 }
   0x6   :  { %vm81_vm0 = vcmp.eq.s32.totalorder %v70_v5, 0  ;;  %v130_v30 = vadd.f32 %v129_v29, %v128_v28  ;;  %s166_s26 = sshll.u32 %s260_s25, 4  ;;  %s168_s29 = sshll.u32 %s302_s3, 4  ;;  %s167_s26 = int_to_ptr.vmem [resolvable:$true] %s166_s26  ;;  %s169_s29 = int_to_ptr.hbm [resolvable:$true] %s168_s29 }
   0x8   :  { %v110_v45 = vld [vmem:[#allocation2] sm:$0x1] }
   0x9   :  { %v127_v48 = vld [vmem:[#allocation3] sm:$0x1] }
   0xa   :  { %75 = vperm.xlu0 %203, %v68_v3  }
  0x74   :  { %v73_v6 = vpop.permute.xlu0 %72 }
  0x75   :  { %vm77_vm1 = vcmp.eq.s32.totalorder %v70_v5, %v73_v6 }
  0x76   :  { %v79_v9 = vsel %vm77_vm1, 0.9, %v258_v8 }
  0x77   :  { %v82_v10 = vsel %vm81_vm0, 0.0, %v79_v9 }
  0x78   :  { %v84_v11 = vmul.f32 %v82_v10, %v65_v7 }
  0x7a   :  { %86 = vadd.xlane.f32.xlu1 %v84_v11 }
  0x7c   :  { %v76_v12 = vpop.permute.xlu0 %75 }
  0x7d   :  { %vm78_vm2 = vcmp.eq.s32.totalorder %v70_v5, %v76_v12 }
  0x7e   :  { %v80_v14 = vsel %vm78_vm2, 0.9, %v258_v8 }
  0x7f   :  { %v83_v15 = vsel %vm81_vm0, 0.0, %v80_v14 }
  0x80   :  { %v85_v16 = vmul.f32 %v83_v15, %v66_v13 }
  0x82   :  { %88 = vadd.xlane.f32.xlu1 %v85_v16 }
  0xed   :  { %v87_v17 = vpop.xlane.xlu1 %86 }
  0xee   :  { %v90_v18 = vsub.f32 -0.8087112, %v87_v17 }
  0xf0   :  { %v106_v21 = vsel %vm102_vm3, %v90_v18, 0.0 }
  0xf1   :  { %v112_v23 = vsel %vm111_vm5, %v106_v21, 0.0 }
  0xf5   :  { %v89_v19 = vpop.xlane.xlu1 %88 }
  0xf6   :  { %v91_v20 = vsub.f32 -0.8087112, %v89_v19 }
  0xf8   :  { %v107_v22 = vsel %vm103_vm4, %v91_v20, 0.0 }
  0xf9   :  { %v113_v24 = vsel %vm111_vm5, %v107_v22, 0.0 }
  0xfa   :  { %v114_v26 = vadd.f32 %v113_v24, %v112_v23 }
  0xfc   :  { %115 = vadd.xlane.f32.xlu2 %v114_v26 }
 0x104   :  { %131 = vadd.xlane.f32.xlu2 %v130_v30 }
 0x16f   :  { %v116_v31 = vpop.xlane.xlu2 %115 }
 0x170   :  { %v117_v32 = vrot.slane %v116_v31, 4 }
 0x172   :  { %v118_v33 = vadd.f32 %v117_v32, %v116_v31 }
 0x174   :  { %v119_v34 = vrot.slane %v118_v33, 2 }
 0x176   :  { %v120_v35 = vadd.f32 %v119_v34, %v118_v33 }
 0x177   :  { %v132_v36 = vpop.xlane.xlu2 %131 }
 0x178   :  { %v133_v37 = vrot.slane %v132_v36, 4  ;;  %v121_v38 = vrot.slane %v120_v35, 1 }
 0x17a   :  { %v134_v39 = vadd.f32 %v133_v37, %v132_v36  ;;  %v122_v40 = vadd.f32 %v121_v38, %v120_v35 }
 0x17c   :  { %v135_v41 = vrot.slane %v134_v39, 2  ;;  %194 = vpush %v122_v40 }
 0x17e   :  { %v136_v42 = vadd.f32 %v135_v41, %v134_v39 }
 0x180   :  { %v137_v43 = vrot.slane %v136_v42, 1 }
 0x182   :  { %v138_v44 = vadd.f32 %v137_v43, %v136_v42 }
 0x184   :  { %196 = vpush %v138_v44 }
 0x1ad   :  { %s195_s0 = spop %194 }
 0x1ae   :  { %v124_v46 = vstv %s195_s0 }
 0x1af   :  { %v125_v47 = vadd.f32 %v124_v46, %v110_v45 }
 0x1b1   :  { %126 = vst [vmem:[#allocation2] sm:$0x1] %v125_v47 }
 0x1b5   :  { %s197_s22 = spop %196 }
 0x1b6   :  { %v140_v49 = vstv %s197_s22 }
 0x1b7   :  { %v141_v50 = vadd.f32 %v140_v49, %v127_v48 }
 0x1b8   :  { %v146_v51 = vld [vmem:[#allocation2] sm:$0x1] }
 0x1b9   :  { %142 = vst [vmem:[#allocation3] sm:$0x1] %v141_v50 }
 0x1ba   :  { %147 = vst [vmem:[#allocation4] sm:$0x1] %v146_v51 }
 0x1bb   :  { %160 = dma.vmem_to_hbm [thread:$0]  %s156_s24, 16, %s158_s21, [#allocation5]  }
 0x1c0   :  { %v148_v52 = vld [vmem:[#allocation3] sm:$0x1] }
 0x1c1   :  { %149 = vst [vmem:[#allocation6] sm:$0x1] %v148_v52 }
 0x1c2   :  { %171 = dma.vmem_to_hbm [thread:$0]  %s167_s26, 16, %s169_s29, [#allocation7]  }
 0x1c3   :  { %252 = dma.done.wait [#allocation5], 16  }
 0x1c4   :  { %253 = vsyncadd [#allocation5], 4294967280 }
 0x1c5   :  { %254 = dma.done.wait [#allocation7], 16  }
 0x1c6   :  { %255 = vsyncadd [#allocation7], 4294967280 }
 0x1c7   :  { %180 = vsyncpa [#allocation5], 1 }
 0x1c8   :  { %181 = vsyncpa [#allocation7], 1 }

</bundles_post_ra>
